<compile_context>
chip_gen: v7x
topology: tpu7x:2x2x1
jax: 0.10.0
libtpu: 0.0.40
codegen_flags: <defaults>
</compile_context>

<pallas_src>
import functools

import jax
import jax.numpy as jnp
from jax.experimental import pallas as pl
from jax.experimental.pallas import tpu as pltpu

EPS = 1e-12  # torch.nn.functional.normalize default eps


def _round_up(x, m):
    return ((x + m - 1) // m) * m


def _tpu_vmem_capacity_bytes():
    try:
        return int(pltpu.get_tpu_info().vmem_capacity_bytes)
    except Exception:
        return 64 * 1024 * 1024  # conservative default (v7x per-TensorCore VMEM)


def _num_tensorcores():
    # v7x has 2 TensorCores per chip; v5e/v6e have 1.
    try:
        info = pltpu.get_tpu_info()
        for attr in ("num_cores", "cores_per_chip", "num_tensorcores",
                     "tensorcores_per_chip", "core_count"):
            n = getattr(info, attr, None)
            if n:
                return int(n)
    except Exception:
        pass
    try:
        n = getattr(jax.devices()[0], "num_cores", None)
        if n:
            return int(n)
    except Exception:
        pass
    return 1


def _choose_tm(rows, per_row_bytes, num_cores, budget):
    """Row-tile size: as big as the VMEM budget allows; grid kept core-friendly."""
    rows8 = _round_up(rows, 8)
    tm = (budget // max(per_row_bytes, 1)) // 8 * 8
    tm = max(8, min(tm, rows8))
    if num_cores >= 2 and rows8 >= 8 * num_cores:
        # Multi-TC chip: make the grid a multiple of num_cores (>= 2 steps per
        # core when rows allow) so both TensorCores stay busy and balanced.
        steps = max(pl.cdiv(rows8, tm), num_cores)
        if rows8 >= 8 * 2 * num_cores:
            steps = max(steps, 2 * num_cores)
        steps = _round_up(steps, num_cores)
        tm = max(8, min(tm, _round_up(pl.cdiv(rows8, steps), 8)))
    return tm


def _ddpn_kernel(img_ref, spt_ref, out_ref, *, d_img, compute_f32, split_store):
    # img_ref: (TM, D_img)  spt_ref: (TM, D_spt)  out_ref: (TM, D_img + D_spt)
    x = img_ref[...]
    xf = x.astype(jnp.float32) if compute_f32 else x
    sq = jnp.sum(xf * xf, axis=-1, keepdims=True)
    # 1 / max(||x||, eps) == rsqrt(max(||x||^2, eps^2)); rsqrt issues on the EUP slot.
    inv = jax.lax.rsqrt(jnp.maximum(sq, EPS * EPS))
    # Accuracy-critical accumulation stays f32; the scale runs in the native dtype.
    x_n = x * inv.astype(x.dtype)
    spt = spt_ref[...]
    if split_store:
        # d_img % 128 == 0: both stores start lane-aligned (dense stores).
        out_ref[:, :d_img] = x_n.astype(out_ref.dtype)
        out_ref[:, d_img:] = spt.astype(out_ref.dtype)
    else:
        # Unaligned concat boundary: build the full tile in VMEM, one dense store.
        out_ref[...] = jnp.concatenate(
            [x_n.astype(out_ref.dtype), spt.astype(out_ref.dtype)], axis=-1)


def ddpn_forward(img_feat, spt_feat, p=None):
    """Pallas implementation of DDPN_NET.forward.  `p` is unused (as in the module)."""
    B, N, D_img = img_feat.shape
    B2, N2, D_spt = spt_feat.shape
    assert (B, N) == (B2, N2)
    D_out = D_img + D_spt
    # NOTE: torch.cat requires matching dtypes; we promote instead (benign upcast).
    out_dtype = jnp.promote_types(img_feat.dtype, spt_feat.dtype)

    rows = B * N
    img2 = img_feat.reshape(rows, D_img)
    spt2 = spt_feat.reshape(rows, D_spt)

    compute_f32 = jnp.dtype(img_feat.dtype) != jnp.dtype(jnp.float32)
    split_store = (D_img % 128 == 0)

    in_itemsize = max(jnp.dtype(img_feat.dtype).itemsize,
                      jnp.dtype(spt_feat.dtype).itemsize)
    out_itemsize = jnp.dtype(out_dtype).itemsize

    # Per-row VMEM bytes (lane-padded to 128 where relevant), including the
    # double-buffered pipeline tiles and in-kernel intermediates, so a large TM
    # cannot silently over-subscribe VMEM.
    d_img_p, d_spt_p, d_out_p = (_round_up(d, 128) for d in (D_img, D_spt, D_out))
    per_row = 2 * ((d_img_p + d_spt_p) * in_itemsize + d_out_p * out_itemsize)
    per_row += 2 * d_img_p * 4  # f32 upcast of x + the scaled copy (conservative)
    if not split_store:
        per_row += d_out_p * out_itemsize  # in-kernel concat tile

    vmem_cap = _tpu_vmem_capacity_bytes()
    budget = min(24 * 1024 * 1024, (vmem_cap * 3) // 8)
    num_cores = _num_tensorcores()
    tm = _choose_tm(rows, per_row, num_cores, budget)

    usage = tm * per_row
    vmem_limit = int(max(16 * 1024 * 1024,
                         min(vmem_cap - 16 * 1024 * 1024,
                             max(32 * 1024 * 1024, usage + 8 * 1024 * 1024))))

    kernel = functools.partial(
        _ddpn_kernel, d_img=D_img, compute_f32=compute_f32, split_store=split_store)

    img_bytes = jnp.dtype(img_feat.dtype).itemsize
    spt_bytes = jnp.dtype(spt_feat.dtype).itemsize
    cost = pl.CostEstimate(
        flops=3 * rows * D_img,   # square + sum + scale
        transcendentals=rows,     # one rsqrt per row
        bytes_accessed=rows * (D_img * img_bytes + D_spt * spt_bytes
                               + D_out * out_itemsize),
    )

    # No wrapper-side padding or output slicing: the partial last block is
    # handled by Pallas masking (per-row op => tail padding rows are harmless).
    out2 = pl.pallas_call(
        kernel,
        out_shape=jax.ShapeDtypeStruct((rows, D_out), out_dtype),
        grid_spec=pltpu.PrefetchScalarGridSpec(
            num_scalar_prefetch=0,
            grid=(pl.cdiv(rows, tm),),
            in_specs=[
                pl.BlockSpec((tm, D_img), lambda i: (i, 0)),
                pl.BlockSpec((tm, D_spt), lambda i: (i, 0)),
            ],
            out_specs=pl.BlockSpec((tm, D_out), lambda i: (i, 0)),
        ),
        compiler_params=pltpu.CompilerParams(
            dimension_semantics=("parallel",),
            vmem_limit_bytes=vmem_limit,
        ),
        cost_estimate=cost,
    )(img2, spt2)

    return out2.reshape(B, N, D_out)


def ddpn_reference(img_feat, spt_feat):
    # pure-JAX reference for validation (matches F.normalize + torch.cat)
    norm = jnp.sqrt(jnp.sum(img_feat * img_feat, axis=2, keepdims=True))
    x_n = img_feat / jnp.maximum(norm, EPS)
    return jnp.concatenate([x_n, spt_feat], axis=2)


if __name__ == "__main__":
    key = jax.random.PRNGKey(0)
    k1, k2 = jax.random.split(key)

    # small shapes consistent with the module's (batch, num_boxes, feat_dim) usage
    B, N, D_img, D_spt = 2, 8, 32, 8
    img_feat = jax.random.normal(k1, (B, N, D_img), dtype=jnp.float32)
    spt_feat = jax.random.normal(k2, (B, N, D_spt), dtype=jnp.float32)

    v = ddpn_forward(img_feat, spt_feat, p=2)
    v = jax.block_until_ready(v)

    v_ref = ddpn_reference(img_feat, spt_feat)
    assert v.shape == (B, N, D_img + D_spt)
    assert jnp.allclose(v, v_ref, atol=1e-5, rtol=1e-5)

    # TODO(synk): the original forward() returns None (drops v); we return v since
    # that is the only computation performed.
    print("KERNEL_OK")
</pallas_src>

<mosaic_0001>
module attributes {stable_mosaic.version = 11 : i64} {
  func.func @_ddpn_kernel(%arg0: i32, %arg1: memref<16x32xf32, #tpu.memory_space<vmem>>, %arg2: memref<16x8xf32, #tpu.memory_space<vmem>>, %arg3: memref<16x40xf32, #tpu.memory_space<vmem>>) attributes {dimension_semantics = [#tpu.dimension_semantics<parallel>], iteration_bounds = array<i64: 1>, scalar_prefetch = 0 : i64, scratch_operands = 0 : i64, tpu.core_type = #tpu.core_type<tc>, window_params = [{transform_indices = @transform_0, window_bounds = array<i64: 16, 32>}, {transform_indices = @transform_1, window_bounds = array<i64: 16, 8>}, {transform_indices = @transform_2, window_bounds = array<i64: 16, 40>}]} {
    %c0 = arith.constant 0 : index
    %c0_0 = arith.constant 0 : index
    %0 = vector.load %arg1[%c0, %c0_0] : memref<16x32xf32, #tpu.memory_space<vmem>>, vector<16x32xf32>
    %1 = arith.mulf %0, %0 : vector<16x32xf32>
    %cst = arith.constant dense<0.000000e+00> : vector<16xf32>
    %2 = vector.multi_reduction <add>, %1, %cst [1] : vector<16x32xf32> to vector<16xf32>
    %3 = vector.shape_cast %2 : vector<16xf32> to vector<16x1xf32>
    %cst_1 = arith.constant 1.000000e-24 : f32
    %4 = vector.broadcast %cst_1 : f32 to vector<16x1xf32>
    %5 = arith.maximumf %3, %4 : vector<16x1xf32>
    %6 = math.rsqrt %5 : vector<16x1xf32>
    %7 = vector.broadcast %6 : vector<16x1xf32> to vector<16x32xf32>
    %8 = arith.mulf %0, %7 : vector<16x32xf32>
    %c0_2 = arith.constant 0 : index
    %c0_3 = arith.constant 0 : index
    %9 = vector.load %arg2[%c0_2, %c0_3] : memref<16x8xf32, #tpu.memory_space<vmem>>, vector<16x8xf32>
    %10 = tpu.concatenate %8, %9 in 1 : vector<16x32xf32>, vector<16x8xf32> -> vector<16x40xf32>
    %c0_4 = arith.constant 0 : index
    %c0_5 = arith.constant 0 : index
    %11 = vector.load %arg3[%c0_4, %c0_5] : memref<16x40xf32, #tpu.memory_space<vmem>>, vector<16x40xf32>
    tpu.vector_store %arg3[%c0_4, %c0_5], %10 {strides = array<i32>} : memref<16x40xf32, #tpu.memory_space<vmem>>, vector<16x40xf32>,
    return
  }
  func.func @transform_0(%arg0: i32) -> (i32, i32) {
    %c0_i32 = arith.constant 0 : i32
    %c0_i32_0 = arith.constant 0 : i32
    return %arg0, %c0_i32 : i32, i32
  }
  func.func @transform_1(%arg0: i32) -> (i32, i32) {
    %c0_i32 = arith.constant 0 : i32
    %c0_i32_0 = arith.constant 0 : i32
    return %arg0, %c0_i32 : i32, i32
  }
  func.func @transform_2(%arg0: i32) -> (i32, i32) {
    %c0_i32 = arith.constant 0 : i32
    %c0_i32_0 = arith.constant 0 : i32
    return %arg0, %c0_i32 : i32, i32
  }
}

</mosaic_0001>

<bundles_post_ra>
// kernel: tpu_custom_call.1
= control target key start
LH: loop header
LB: loop body
LE: loop exit
PB: predicated region body
PF: predicated region fallthrough
CT: control target
= control target key end

     0   :  { %vm16_vm0 = vcmask 261120   ;;  %s92_s15 = smov 32   ;;  %s139_s0 = inlined_call_operand.vmem [shape: f32[16,32], index: 0, kind: input, shape index: {}]   ;;  %s140_s1 = inlined_call_operand.vmem [shape: f32[16,8], index: 1, kind: input, shape index: {}]   ;;  %s141_s2 = inlined_call_operand.hbm [shape: f32[16,40], index: 2, kind: output, shape index: {}]  }
   0x1   :  { %v12_v0 = vld [vmem:[%s139_s0] sm:$0xff]  ;;  %v13_v1 = vld [vmem:[%s139_s0 + $0x8] sm:$0xff] }
   0x2   :  { %v29_v2 = vld [vmem:[%s140_s1] sm:$0xff]  ;;  %v14_v3 = vmul.f32 %v12_v0, %v12_v0  ;;  %v15_v4 = vmul.f32 %v13_v1, %v13_v1 }
   0x3   :  { %33 = vrot.lane.b32.xlu1 %v29_v2, %s92_s15 }
   0x4   :  { %7 = vsyncpa [#allocation3], 0  ;;  %v30_v5 = vld [vmem:[%s140_s1 + $0x8] sm:$0xff]  ;;  %v17_v6 = vsel %vm16_vm0, %v14_v3, 0.0  ;;  %v20_v7 = vsel %vm16_vm0, %v15_v4, 0.0  ;;  %vm41_vm1 = vcmask 326656  }
   0x5   :  { %18 = vadd.xlane.f32.xlu0 %v17_v6  ;;  %s93_s0 = smov [#allocation2]  }
   0x6   :  { %s49_s18 = sshll.u32 %s93_s0, 4  ;;  %s50_s18 = int_to_ptr.vmem [resolvable:$true] %s49_s18 }
   0x7   :  { %35 = vrot.lane.b32.xlu1 %v30_v5, %s92_s15  ;;  %s68_s1 = scalar_lea.vmem %s50_s18, 256  ;;  %p73_p1 = scmp.lt.s32.totalorder %s50_s18, %s50_s18 }
   0x8   :  { %p69_p0 = scmp.ne.s32.totalorder %s50_s18, %s68_s1  ;;  %p74_p2 = scmp.lt.s32.totalorder %s68_s1, %s68_s1 }
   0x9   :  { %21 = vadd.xlane.f32.xlu0 %v20_v7 }
   0xa   :  { %p75_p3 = por %p74_p2, %p73_p1 }
   0xc   :  { %p76_p4 = pnand %p75_p3, %p69_p0 }
  0x75   :  { %v34_v12 = vpop.permute.xlu1 %33 }
  0x79   :  { %v36_v17 = vpop.permute.xlu1 %35 }
  0x92   :  { %v19_v8 = vpop.xlane.xlu0 %18 }
  0x93   :  { %v23_v9 = vmax.f32 %v19_v8, 1e-24 }
  0x95   :  { %64 = vrsqrt.f32 %v23_v9 }
  0x96   :  { %v22_v10 = vpop.xlane.xlu0 %21 }
  0x97   :  { %v24_v11 = vmax.f32 %v22_v10, 1e-24 }
  0x99   :  { %66 = vrsqrt.f32 %v24_v11 }
  0x9f   :  { %v65_v13 = vpop.eup %64 }
  0xa0   :  { %v27_v14 = vmul.f32 %v65_v13, %v12_v0 }
  0xa2   :  { %v39_v15 = vsel %vm16_vm0, %v27_v14, %v34_v12 }
  0xa3   :  { %v67_v16 = vpop.eup %66  ;;  %42 = vst.msk [vmem:[#allocation2] sm:$0xff] %vm41_vm1, %v39_v15 }
  0xa4   :  { %v28_v18 = vmul.f32 %v67_v16, %v13_v1 }
  0xa6   :  { %v40_v19 = vsel %vm16_vm0, %v28_v18, %v36_v17 }
  0xa7   :  { %43 = vst.msk [vmem:[#allocation2 + $0x8] sm:$0xff] %vm41_vm1, %v40_v19 }
  0xa8   :  { %79 = shalt.err (!%p76_p4)
}
  0xa9   :  { %s80_s21 = scalar_lea.hbm %s141_s2, 256 }
  0xaa   :  { %p81_p5 = scmp.ne.s32.totalorder %s141_s2, %s80_s21  ;;  %p84_p6 = scmp.lt.u32.totalorder %s80_s21, %s141_s2 }
  0xac   :  { %p86_p7 = pnand %p84_p6, %p81_p5 }
  0xae   :  { %89 = shalt.err (!%p86_p7)
}
  0xaf   :  { %s94_s26 = smov 128   ;;  %s95_s27 = smov 8  }
  0xb0   :  { %55 = dma.vmem_to_hbm [thread:$0]  %s50_s18, 256, %s141_s2, [#allocation3], %s94_s26, %s94_s26, %s95_s27  }
  0xb1   :  { %90 = dma.done.wait [#allocation3], 256  }
  0xb2   :  { %91 = vsyncadd [#allocation3], 4294967040 }
  0xb3   :  { %59 = vsyncpa [#allocation3], 1 }

</bundles_post_ra>
